<compile_context>
chip_gen: v7x
topology: tpu7x:2x2x1
jax: 0.10.0
libtpu: 0.0.40
codegen_flags: <defaults>
</compile_context>

<pallas_src>
import functools

import jax
import jax.numpy as jnp
from jax import lax
from jax.experimental import pallas as pl
from jax.experimental.pallas import tpu as pltpu

EPS = 1e-5            # nn.BatchNorm2d default
NEG_SLOPE = 0.01      # nn.LeakyReLU default
LANE = 128
SUBLANE = 8

# Conservative VMEM numbers that fit every generation
# (v5e/v6e: 128 MiB physical / 16-32 MiB scoped default, v7x: 64 MiB physical).
VMEM_LIMIT_BYTES = 48 * 1024 * 1024        # scoped limit handed to the compiler
PIPELINE_VMEM_BUDGET = 32 * 1024 * 1024    # budget used to size the row tile
MAX_TILE_ROWS = 1024


def _round_up(x, m):
    return (x + m - 1) // m * m


def _resident_block_spec(block_shape, index_map):
    """BlockSpec for an operand whose block index is constant across the grid.

    Single-buffer it (the block is only DMA'd once) to reclaim VMEM; fall back
    to a plain BlockSpec if this jax version lacks pipeline_mode/Buffered.
    """
    try:
        return pl.BlockSpec(block_shape, index_map, pipeline_mode=pl.Buffered(1))
    except (TypeError, AttributeError):
        return pl.BlockSpec(block_shape, index_map)


def _choose_row_tiling(nhw, kp, cp, requested=None):
    """Pick (tile_rows, padded_rows, num_tiles) under a VMEM budget.

    Keeps >= 2 grid steps whenever there is more than one sublane of work
    (BlockSpec pipelining + megacore sharding of the "parallel" axis).
    """
    # Bytes of VMEM that scale with tile_rows (pass 1 dominates pass 2):
    #   double-buffered bf16 x tile + double-buffered bf16 y_pre tile.
    per_row = 2 * kp * 2 + 2 * cp * 2
    # Resident (single-buffered) bf16 weight + double-buffered (8, Cp) f32 stats.
    fixed = kp * cp * 2 + 2 * SUBLANE * cp * 4
    cap = max(PIPELINE_VMEM_BUDGET - fixed, SUBLANE * per_row) // per_row
    cap = max(SUBLANE, (cap // SUBLANE) * SUBLANE)
    cap = min(cap, MAX_TILE_ROWS)
    if requested is not None:
        cap = min(cap, max(SUBLANE, _round_up(requested, SUBLANE)))
    # Never a single full-array block when avoidable: aim for >= 2 tiles.
    half = _round_up(max(pl.cdiv(nhw, 2), SUBLANE), SUBLANE)
    tr = min(cap, half)
    nhw_p = _round_up(nhw, tr)
    return tr, nhw_p, nhw_p // tr


# ---------------------------------------------------------------------------
# Pass 1: conv tile (one MXU matmul) + per-tile partial BatchNorm statistics.
# ---------------------------------------------------------------------------
def conv_stats_kernel(x_ref, w_ref, y_ref, stats_ref):
    # x_ref:     (TR, Kp)  bf16 im2col rows of this tile
    # w_ref:     (Kp, Cp)  bf16 packed conv weight (resident, single-buffered)
    # y_ref:     (TR, Cp)  bf16 pre-BN conv output tile (bf16 halves HBM traffic)
    # stats_ref: (8,  Cp)  f32; row 0 = per-channel sum, row 1 = sum of squares
    acc = jnp.dot(x_ref[...], w_ref[...], preferred_element_type=jnp.float32)
    y_ref[...] = acc.astype(jnp.bfloat16)

    s = jnp.sum(acc, axis=0, keepdims=True)           # (1, Cp)  from f32 acc
    ss = jnp.sum(acc * acc, axis=0, keepdims=True)    # (1, Cp)
    pad = jnp.zeros((SUBLANE - 2, s.shape[1]), jnp.float32)
    stats_ref[...] = jnp.concatenate([s, ss, pad], axis=0)


# ---------------------------------------------------------------------------
# Pass 2: fused BatchNorm affine (precomputed scale/shift) + LeakyReLU.
# ---------------------------------------------------------------------------
def bn_act_kernel(y_ref, scale_ref, shift_ref, o_ref, *, cout):
    # y_ref: (TR, Cp) bf16 ; scale/shift: (1, Cp) f32 ; o_ref: (TR, Cout) f32
    y = y_ref[...].astype(jnp.float32) * scale_ref[...] + shift_ref[...]
    y = jnp.where(y > 0, y, NEG_SLOPE * y)
    o_ref[...] = y[:, :cout]                  # drop channel padding at the store


def cnn_block(x_nchw, weight_oihw, gamma, beta, *, stride=1, padding=1,
              tile_rows=None):
    """Forward pass of CNNBlock (conv bias=False -> BN train-mode -> LeakyReLU)."""
    N, Cin, Hin, Win = x_nchw.shape
    Cout, Cin_w, KH, KW = weight_oihw.shape
    assert Cin_w == Cin
    H = (Hin + 2 * padding - KH) // stride + 1
    W = (Win + 2 * padding - KW) // stride + 1
    NHW = N * H * W
    K = Cin * KH * KW
    Kp = _round_up(K, LANE)        # lane-dense contraction dim
    Cp = _round_up(Cout, LANE)     # lane-dense output channels (MXU operand)

    tr, NHWp, num_tiles = _choose_row_tiling(NHW, Kp, Cp, tile_rows)

    # ---- wrapper glue (XLA): bf16 layout, spatial pad, im2col, weight pack ---
    x_nhwc = jnp.transpose(x_nchw, (0, 2, 3, 1)).astype(jnp.bfloat16)
    x_pad = jnp.pad(x_nhwc, ((0, 0), (padding, padding), (padding, padding), (0, 0)))
    cols = []
    for kh in range(KH):
        for kw in range(KW):
            cols.append(x_pad[:, kh:kh + (H - 1) * stride + 1:stride,
                                 kw:kw + (W - 1) * stride + 1:stride, :])
    # last-axis ordering is (kh, kw, cin)
    x_cols = jnp.concatenate(cols, axis=-1).reshape(NHW, K)
    # zero-pad rows (tiling) and lanes (contraction); zeros are exact no-ops
    # for the matmul and for the BN sums.
    x_cols = jnp.pad(x_cols, ((0, NHWp - NHW), (0, Kp - K)))

    # OIHW -> (KH, KW, Cin, Cout) -> (K, Cout), matching the im2col ordering.
    w = jnp.transpose(weight_oihw, (2, 3, 1, 0)).astype(jnp.bfloat16).reshape(K, Cout)
    w = jnp.pad(w, ((0, Kp - K), (0, Cp - Cout)))

    cparams = pltpu.CompilerParams(
        dimension_semantics=("parallel",),
        vmem_limit_bytes=VMEM_LIMIT_BYTES)

    # ---- pass 1: conv + per-tile partial BN stats ---------------------------
    y_pre, stats = pl.pallas_call(
        conv_stats_kernel,
        out_shape=(
            jax.ShapeDtypeStruct((NHWp, Cp), jnp.bfloat16),
            jax.ShapeDtypeStruct((num_tiles * SUBLANE, Cp), jnp.float32),
        ),
        grid=(num_tiles,),
        in_specs=[
            pl.BlockSpec((tr, Kp), lambda i: (i, 0)),
            _resident_block_spec((Kp, Cp), lambda i: (0, 0)),
        ],
        out_specs=(
            pl.BlockSpec((tr, Cp), lambda i: (i, 0)),
            pl.BlockSpec((SUBLANE, Cp), lambda i: (i, 0)),
        ),
        compiler_params=cparams,
    )(x_cols, w)

    # ---- merge partial stats -> per-channel scale / shift (tiny, XLA) -------
    stats = stats.reshape(num_tiles, SUBLANE, Cp)
    total_sum = jnp.sum(stats[:, 0, :], axis=0)
    total_sumsq = jnp.sum(stats[:, 1, :], axis=0)
    mean = total_sum / NHW           # padded rows are exact zeros -> no effect
    var = jnp.maximum(total_sumsq / NHW - mean * mean, 0.0)   # biased (train mode)
    # TODO(synk): E[x^2]-E[x]^2 in f32 can cancel for very large NHW with
    # non-centered activations; switch to a Welford-style per-tile merge if BN
    # accuracy matters at that scale.

    gamma_p = jnp.pad(gamma.astype(jnp.float32), (0, Cp - Cout), constant_values=1.0)
    beta_p = jnp.pad(beta.astype(jnp.float32), (0, Cp - Cout))
    scale = gamma_p * lax.rsqrt(var + EPS)
    shift = beta_p - mean * scale
    # TODO(synk): BatchNorm running_mean/running_var buffer updates (a training
    # side effect, not part of the returned forward value) are not emitted.

    # ---- pass 2: normalize + LeakyReLU, compact unpadded-channel output -----
    out_flat = pl.pallas_call(
        functools.partial(bn_act_kernel, cout=Cout),
        out_shape=jax.ShapeDtypeStruct((NHWp, Cout), jnp.float32),
        grid=(num_tiles,),
        in_specs=[
            pl.BlockSpec((tr, Cp), lambda i: (i, 0)),
            pl.BlockSpec((1, Cp), lambda i: (0, 0)),
            pl.BlockSpec((1, Cp), lambda i: (0, 0)),
        ],
        out_specs=pl.BlockSpec((tr, Cout), lambda i: (i, 0)),
        compiler_params=cparams,
    )(y_pre, scale.reshape(1, Cp), shift.reshape(1, Cp))

    # Only the semantically required NCHW relayout remains (a NHWC consumer
    # could skip this transpose entirely).
    out_nhwc = out_flat[:NHW].reshape(N, H, W, Cout)
    return jnp.transpose(out_nhwc, (0, 3, 1, 2))     # back to NCHW like PyTorch


def cnn_block_reference(x_nchw, weight_oihw, gamma, beta, *, stride=1, padding=1,
                        match_kernel_dtypes=False):
    """Pure-JAX reference (XLA conv) for correctness checking."""
    x = x_nchw.astype(jnp.float32)
    w = weight_oihw.astype(jnp.float32)
    if match_kernel_dtypes:
        # mirror the kernel's bf16 MXU operands (f32 accumulation in both)
        x = x.astype(jnp.bfloat16).astype(jnp.float32)
        w = w.astype(jnp.bfloat16).astype(jnp.float32)
    y = lax.conv_general_dilated(
        x, w, window_strides=(stride, stride),
        padding=[(padding, padding), (padding, padding)],
        dimension_numbers=("NCHW", "OIHW", "NCHW"))
    mean = jnp.mean(y, axis=(0, 2, 3), keepdims=True)
    var = jnp.mean(jnp.square(y - mean), axis=(0, 2, 3), keepdims=True)
    if match_kernel_dtypes:
        # mirror the kernel's bf16 round-trip of the pre-BN activations
        y = y.astype(jnp.bfloat16).astype(jnp.float32)
    y = (y - mean) * lax.rsqrt(var + EPS)
    y = y * gamma.reshape(1, -1, 1, 1) + beta.reshape(1, -1, 1, 1)
    return jnp.where(y > 0, y, NEG_SLOPE * y)


if __name__ == "__main__":
    key = jax.random.PRNGKey(0)
    k_x, k_w, k_g, k_b = jax.random.split(key, 4)

    N, C_in, H, W = 2, 4, 16, 16
    C_out, Kk = 8, 3

    x = jax.random.normal(k_x, (N, C_in, H, W), dtype=jnp.float32)
    # Conv2d weight (bias=False): shape (out_channels, in_channels, KH, KW)
    weight = 0.1 * jax.random.normal(k_w, (C_out, C_in, Kk, Kk), dtype=jnp.float32)
    # BatchNorm2d affine params (non-trivial to exercise the affine path)
    gamma = 1.0 + 0.1 * jax.random.normal(k_g, (C_out,), dtype=jnp.float32)
    beta = 0.1 * jax.random.normal(k_b, (C_out,), dtype=jnp.float32)

    ref_q = jax.block_until_ready(
        cnn_block_reference(x, weight, gamma, beta, padding=1,
                            match_kernel_dtypes=True))
    ref_f32 = jax.block_until_ready(
        cnn_block_reference(x, weight, gamma, beta, padding=1))

    # tile_rows=128 -> 4-step row grid, exercising the multi-tile partial-stats
    # path; tile_rows=None exercises the VMEM-budgeted default (2 tiles here).
    for req in (128, None):
        out = cnn_block(x, weight, gamma, beta, stride=1, padding=1, tile_rows=req)
        out = jax.block_until_ready(out)
        assert out.shape == (N, C_out, H, W), out.shape

        # Tight check against a reference that mirrors the kernel's dtype path
        # (bf16 MXU operands, f32 stats, bf16 y_pre round-trip).
        err_q = float(jnp.max(jnp.abs(out - ref_q)))
        assert err_q < 2e-3, (req, err_q)

        # Loose sanity check against the pure-f32 PyTorch-semantics reference.
        err_f = float(jnp.max(jnp.abs(out - ref_f32)))
        assert err_f < 6e-2, (req, err_f)

    print("KERNEL_OK")
</pallas_src>

<mosaic_0001>
module attributes {stable_mosaic.version = 11 : i64} {
  func.func @conv_stats_kernel(%arg0: i32, %arg1: memref<128x128xbf16, #tpu.memory_space<vmem>>, %arg2: memref<128x128xbf16, #tpu.memory_space<vmem>>, %arg3: memref<128x128xbf16, #tpu.memory_space<vmem>>, %arg4: memref<8x128xf32, #tpu.memory_space<vmem>>) attributes {dimension_semantics = [#tpu.dimension_semantics<parallel>], iteration_bounds = array<i64: 4>, scalar_prefetch = 0 : i64, scratch_operands = 0 : i64, tpu.core_type = #tpu.core_type<tc>, window_params = [{transform_indices = @transform_0, window_bounds = array<i64: 128, 128>}, {pipeline_mode = #tpu.pipeline_mode<synchronous>, transform_indices = @transform_1, window_bounds = array<i64: 128, 128>}, {transform_indices = @transform_2, window_bounds = array<i64: 128, 128>}, {transform_indices = @transform_3, window_bounds = array<i64: 8, 128>}]} {
    %c0 = arith.constant 0 : index
    %c0_0 = arith.constant 0 : index
    %0 = vector.load %arg1[%c0, %c0_0] : memref<128x128xbf16, #tpu.memory_space<vmem>>, vector<128x128xbf16>
    %c0_1 = arith.constant 0 : index
    %c0_2 = arith.constant 0 : index
    %1 = vector.load %arg2[%c0_1, %c0_2] : memref<128x128xbf16, #tpu.memory_space<vmem>>, vector<128x128xbf16>
    %cst = arith.constant dense<0.000000e+00> : vector<128x128xf32>
    %2 = tpu.matmul %0, %1, %cst {dimension_numbers = #tpu.dot_dimension_numbers<[1], [0], [0], [1], [0, 0, 1, 1], [], []>} : vector<128x128xbf16>, vector<128x128xbf16>, vector<128x128xf32> -> vector<128x128xf32>
    %3 = arith.truncf %2 : vector<128x128xf32> to vector<128x128xbf16>
    %c0_3 = arith.constant 0 : index
    %c0_4 = arith.constant 0 : index
    %4 = vector.load %arg3[%c0_3, %c0_4] : memref<128x128xbf16, #tpu.memory_space<vmem>>, vector<128x128xbf16>
    tpu.vector_store %arg3[%c0_3, %c0_4], %3 {strides = array<i32>} : memref<128x128xbf16, #tpu.memory_space<vmem>>, vector<128x128xbf16>,
    %cst_5 = arith.constant dense<0.000000e+00> : vector<128xf32>
    %5 = vector.multi_reduction <add>, %2, %cst_5 [0] : vector<128x128xf32> to vector<128xf32>
    %6 = vector.shape_cast %5 : vector<128xf32> to vector<1x128xf32>
    %7 = arith.mulf %2, %2 : vector<128x128xf32>
    %cst_6 = arith.constant dense<0.000000e+00> : vector<128xf32>
    %8 = vector.multi_reduction <add>, %7, %cst_6 [0] : vector<128x128xf32> to vector<128xf32>
    %9 = vector.shape_cast %8 : vector<128xf32> to vector<1x128xf32>
    %cst_7 = arith.constant 0.000000e+00 : f32
    %10 = vector.broadcast %cst_7 : f32 to vector<6x128xf32>
    %11 = tpu.concatenate %6, %9, %10 in 0 : vector<1x128xf32>, vector<1x128xf32>, vector<6x128xf32> -> vector<8x128xf32>
    %c0_8 = arith.constant 0 : index
    %c0_9 = arith.constant 0 : index
    %12 = vector.load %arg4[%c0_8, %c0_9] : memref<8x128xf32, #tpu.memory_space<vmem>>, vector<8x128xf32>
    tpu.vector_store %arg4[%c0_8, %c0_9], %11 {strides = array<i32>} : memref<8x128xf32, #tpu.memory_space<vmem>>, vector<8x128xf32>,
    return
  }
  func.func @transform_0(%arg0: i32) -> (i32, i32) {
    %c0_i32 = arith.constant 0 : i32
    %c0_i32_0 = arith.constant 0 : i32
    return %arg0, %c0_i32 : i32, i32
  }
  func.func @transform_1(%arg0: i32) -> (i32, i32) {
    %c0_i32 = arith.constant 0 : i32
    %c0_i32_0 = arith.constant 0 : i32
    %c0_i32_1 = arith.constant 0 : i32
    return %c0_i32, %c0_i32_0 : i32, i32
  }
  func.func @transform_2(%arg0: i32) -> (i32, i32) {
    %c0_i32 = arith.constant 0 : i32
    %c0_i32_0 = arith.constant 0 : i32
    return %arg0, %c0_i32 : i32, i32
  }
  func.func @transform_3(%arg0: i32) -> (i32, i32) {
    %c0_i32 = arith.constant 0 : i32
    %c0_i32_0 = arith.constant 0 : i32
    return %arg0, %c0_i32 : i32, i32
  }
}

</mosaic_0001>

<bundles_post_ra>
// kernel: tpu_custom_call.1
= control target key start
LH: loop header
LB: loop body
LE: loop exit
PB: predicated region body
PF: predicated region fallthrough
CT: control target
= control target key end

     0   :  { %9 = vsyncpa [#allocation3], 0  ;;  %s1487_s0 = inlined_call_operand.hbm [shape: bf16[512,128], index: 0, kind: input, shape index: {}]   ;;  %s1488_s1 = inlined_call_operand.hbm [shape: bf16[128,128], index: 1, kind: input, shape index: {}]   ;;  %s1489_s2 = inlined_call_operand.hbm [shape: bf16[512,128], index: 2, kind: output, shape index: {0}]   ;;  %s1490_s3 = inlined_call_operand.hbm [shape: f32[32,128], index: 3, kind: output, shape index: {1}]  }
   0x1   :  { %11 = vsyncpa [#allocation3 + $0x1], 0 }
   0x2   :  { %12 = vsyncpa [#allocation6], 0 }
   0x3   :  { %13 = vsyncpa [#allocation4], 0 }
   0x4   :  { %15 = vsyncpa [#allocation4 + $0x1], 0 }
   0x5   :  { %16 = vsyncpa [#allocation9], 0 }
   0x6   :  { %18 = vsyncpa [#allocation9 + $0x1], 0  ;;  %s1185_s12 = smov 0   ;;  %s1187_s13 = smov 0  }
   0x7   :  { %s1189_s14 = smov 0   ;;  %s1191_s15 = smov 0  }
   0x8 LB: > { %s1206_s16 = sadd.s32 4294967295, %s1155_s15   ;;  %s733_s17 = sadd.s32 4294967294, %s1155_s15   ;;  %s1155_s15 = sphi %s1191_s15, %s1509_s15   ;;  %s1151_s14 = sphi %s1189_s14, %s1508_s14   ;;  %s1147_s13 = sphi %s1187_s13, %s1507_s13   ;;  %s1143_s12 = sphi %s1185_s12, %s1506_s12  }
   0x9   : > { %p44_p0 = scmp.ne.s32.totalorder %s1147_s13, %s1143_s12  ;;  %p1491_p1 = scmp.eq.s32.totalorder %s1206_s16, 0 }
   0xa   : > { %p95_p3 = scmp.eq.s32.totalorder %s733_s17, 3  ;;  %p734_p5 = scmp.ge.s32.totalorder %s1155_s15, 1 }
   0xb   : > { %p1215_p4 = por %p1491_p1, %p44_p0  ;;  %p128_p7 = scmp.lt.s32.totalorder %s1155_s15, 5 }
   0xc   : > { %p1220_p6 = por %p95_p3, %p44_p0  ;;  %s1157_s21 = smov [#allocation5]  }
   0xd   : > { %s1494_s18 = scalar_select %p1215_p4, 1, 0 }
   0xe   : > { %s1495_s19 = scalar_select %p1220_p6, 1, 0 }
   0xf   : > { %p1225_p8 = pnand %p734_p5, %p128_p7  ;;  %s140_s22 = sshll.u32 %s1157_s21, 4  ;;  %s141_s22 = int_to_ptr.vmem [resolvable:$true] %s140_s22 }
  0x10   : > { %s1238_s24 = sadd.s32 1, %s1155_s15   ;;  %s31_s25 = sadd.s32 1, %s1151_s14 }
  0x11   : > { %s1496_s20 = scalar_select %p1225_p8, 1, 0 }
  0x12   : > { %p923_p9 = pneg %p1225_p8  ;;  %s28_s26 = ssub.s32 %s1155_s15, %s1238_s24 }
  0x13   : > { %s995_s29 = scalar_lea.hbm %s1488_s1, 1024 }
  0x14   : > { %p1233_p10 = pnand %p923_p9, %p1491_p1  ;;  %p996_p11 = scmp.ne.s32.totalorder %s1488_s1, %s995_s29 }
  0x15   : > { %p1002_p3 = scmp.lt.u32.totalorder %s995_s29, %s1488_s1 }
  0x16   : > { %p997_p12 = pneg %p1233_p10 }
  0x18   : > { %p998_p13 = pnand %p997_p12, %p996_p11 }
  0x1a   : > { %p999_p0 = pneg %p998_p13 }
  0x1c   : > { %p1004_p5 = pnand %p1002_p3, %p999_p0 }
  0x1e   : > { %1007 = shalt.err (!%p1004_p5)
}
  0x1f   : > { %s1008_s7 = scalar_lea.vmem %s141_s22, 1024  ;;  %p1016_p2 = scmp.lt.s32.totalorder %s141_s22, %s141_s22 }
  0x20   : > { %p1009_p7 = scmp.ne.s32.totalorder %s141_s22, %s1008_s7  ;;  %p1017_p6 = scmp.lt.s32.totalorder %s1008_s7, %s1008_s7 }
  0x22   : > { %p1011_p9 = pnand %p1009_p7, %p997_p12  ;;  %p1018_p4 = por %p1017_p6, %p1016_p2 }
  0x24   : > { %p1012_p1 = pneg %p1011_p9 }
  0x26   : > { %p1019_p8 = pnand %p1018_p4, %p1012_p1 }
  0x28   : > { %1022 = shalt.err (!%p1019_p8)
}
  0x29   : > { %s1158_s8 = smov 64   ;;  %s1159_s9 = smov 4  }
  0x2a   : > { %926 = dma.hbm_to_vmem [thread:$0]  (!%p1233_p10), %s1488_s1, 1024, %s141_s22, [#allocation6], %s1158_s8, %s1158_s8, %s1159_s9  }
  0x2b   : > { %p29_p1 = scmp.eq.s32.totalorder %s28_s26, 0  ;;  %p38_p2 = scmp.ne.s32.totalorder %s1151_s14, %s1147_s13 }
  0x2c   : > { %p39_p4 = scmp.eq.s32.totalorder %s1155_s15, 0  ;;  %p939_p6 = scmp.lt.s32.totalorder %s1155_s15, 4 }
  0x2d   : > { %s1267_s17 = scalar_select %p29_p1, %s1151_s14, %s31_s25  }
  0x2e   : > { %p40_p8 = por %p39_p4, %p38_p2  ;;  %p1498_p11 = scmp.eq.s32.totalorder %s1206_s16, 3 }
  0x2f   : > { %s154_s23 = sand.u32 1, %s1151_s14   ;;  %s784_s27 = sshll.u32 %s1155_s15, 10 }
  0x30   : > { %p1271_p12 = por %p1498_p11, %p38_p2  ;;  %s737_s28 = sshll.u32 %s154_s23, 6 }
  0x31   : > { %s1280_s4 = scalar_lea.hbm %s1487_s0, %s784_s27  ;;  %s158_s22 = scalar_lea.vmem [#allocation2], %s737_s28 }
  0x32   : > { %s165_s25 = sshll.u32 %s158_s22, 4  ;;  %p1282_p10 = pnand %p939_p6, %p40_p8  ;;  %s1286_s25 = int_to_ptr.vmem [resolvable:$true] %s165_s25 }
  0x33   : > { %s1288_s5 = scalar_lea.sflag [#allocation3], %s154_s23  ;;  %s1023_s6 = scalar_lea.hbm %s1280_s4, 1024 }
  0x34   : > { %p1024_p13 = scmp.ne.s32.totalorder %s1280_s4, %s1023_s6  ;;  %p1025_p0 = pneg %p1282_p10 }
  0x35   : > { %s1028_s11 = scalar_lea.hbm %s1487_s0, 4096  ;;  %p1029_p7 = scmp.lt.u32.totalorder %s1280_s4, %s1487_s0 }
  0x36   : > { %p1026_p3 = pnand %p1025_p0, %p1024_p13  ;;  %p1030_p9 = scmp.lt.u32.totalorder %s1028_s11, %s1023_s6 }
  0x37   : > { %p1032_p2 = scmp.lt.u32.totalorder %s1023_s6, %s1280_s4 }
  0x38   : > { %p1027_p5 = pneg %p1026_p3  ;;  %p1031_p1 = por %p1030_p9, %p1029_p7 }
  0x3a   : > { %p1033_p4 = por %p1032_p2, %p1031_p1 }
  0x3c   : > { %p1034_p6 = pnand %p1033_p4, %p1027_p5 }
  0x3e   : > { %1037 = shalt.err (!%p1034_p6)
}
  0x3f   : > { %s1038_s23 = scalar_lea.vmem %s1286_s25, 1024  ;;  %s1160_s29 = smov [#allocation2]  }
  0x40   : > { %p1039_p8 = scmp.ne.s32.totalorder %s1286_s25, %s1038_s23  ;;  %s1043_s30 = sshll.u32 %s1160_s29, 4  ;;  %s1044_s30 = int_to_ptr.vmem [resolvable:$false] %s1043_s30 }
  0x41   : > { %s1045_s22 = scalar_lea.vmem %s1044_s30, 2048  ;;  %p1046_p3 = scmp.lt.s32.totalorder %s1286_s25, %s1044_s30 }
  0x42   : > { %p1041_p11 = pnand %p1039_p8, %p1025_p0  ;;  %p1047_p7 = scmp.lt.s32.totalorder %s1045_s22, %s1038_s23 }
  0x44   : > { %p1042_p13 = pneg %p1041_p11  ;;  %p1048_p9 = por %p1047_p7, %p1046_p3 }
  0x46   : > { %p1049_p1 = pnand %p1048_p9, %p1042_p13 }
  0x48   : > { %1052 = shalt.err (!%p1049_p1)
}
  0x49   : > { %930 = dma.hbm_to_vmem [thread:$0]  (!%p1282_p10), %s1280_s4, 1024, %s1286_s25, %s1288_s5, %s1158_s8, %s1158_s8, %s1159_s9  }
  0x4a   : > { %p1501_p0 = scmp.ne.s32.totalorder %s1496_s20, 0 }
  0x4b   : > { %s1322_s6 = sand.u32 (!%p1501_p0), 1, %s1147_s13   ;;  %p1502_p5 = scmp.ne.s32.totalorder (!%p1501_p0), %s1494_s18, 0 }
  0x4c   : > { %177 = sbr.rel (%p1501_p0) target bundleno = 406 (0x196), region = 28  ;;  %s741_s7 = sshll.u32 (!%p1501_p0), %s1322_s6, 6 }
  0x4d   : > { %s180_s10 = scalar_lea.sflag (!%p1501_p0), [#allocation3], %s1322_s6  ;;  %s1328_s26 = scalar_lea.vmem (!%p1501_p0), [#allocation2], %s741_s7 }
  0x53   : > { %1126 = dma.done.wait (%p1502_p5), %s180_s10, 1024  }
  0x54   : > { %1128 = vsyncadd (%p1502_p5), %s180_s10, 4294966272  ;;  %p1503_p10 = scmp.eq.s32.totalorder %s1206_s16, 0 }
  0x56   : > { %1130 = dma.done.wait (%p1503_p10), [#allocation6], 1024   ;;  %p1504_p2 = pmov %p1503_p10 }
  0x57   : > { %v979_v0 = vld [vmem:[#allocation5] sm:$0xff]   ;;  %v980_v1 = vld [vmem:[#allocation5 + $0x8] sm:$0xff]   ;;  %v981_v2 = vld [vmem:[#allocation5 + $0x10] sm:$0xff]   ;;  %s1360_s18 = scalar_lea.vmem [#allocation7], %s741_s7  ;;  %s801_s8 = sshll.u32 %s1206_s16, 10 }
  0x58   : > { %1132 = vsyncadd (%p1504_p2), [#allocation6], 4294966272  ;;  %865 = vmatprep.subr.bf16.mxu0 %v979_v0  ;;  %897 = vmatprep.subr.bf16.mxu1 %v979_v0  ;;  %v982_v3 = vld [vmem:[#allocation5 + $0x18] sm:$0xff]   ;;  %v987_v4 = vld [vmem:[%s1328_s26] sm:$0xff]   ;;  %s605_s20 = sshll.u32 %s1360_s18, 4  ;;  %s1381_s25 = scalar_lea.hbm %s1489_s2, %s801_s8  ;;  %s1383_s20 = int_to_ptr.vmem [resolvable:$true] %s605_s20 }
  0x59   : > { %866 = vmatpush3.bf16.msra.mxu0 %v979_v0  ;;  %905 = vmatpush3.bf16.msra.mxu1 %v979_v0  ;;  %v983_v5 = vld [vmem:[#allocation5 + $0x20] sm:$0xff]   ;;  %v984_v7 = vld [vmem:[#allocation5 + $0x28] sm:$0xff]   ;;  %v985_v8 = vld [vmem:[#allocation5 + $0x30] sm:$0xff]   ;;  %s587_s5 = scalar_lea.sflag [#allocation4], %s1322_s6  ;;  %s1053_s11 = scalar_lea.vmem %s1383_s20, 1024 }
  0x5a   : > { %867 = vmatprep.subr.bf16.mxu0 %v980_v1  ;;  %898 = vmatprep.subr.bf16.mxu1 %v980_v1  ;;  %v991_v6 = vld [vmem:[%s1328_s26 + $0x20] sm:$0xff]   ;;  %v986_v9 = vld [vmem:[#allocation5 + $0x38] sm:$0xff]   ;;  %v988_v10 = vld [vmem:[%s1328_s26 + $0x8] sm:$0xff]   ;;  %p1054_p4 = scmp.ne.s32.totalorder %s1383_s20, %s1053_s11  ;;  %s1161_s27 = smov [#allocation7]  }
  0x5b   : > { %881 = vmatprep.mubr.bf16.mxu0 %v987_v4  ;;  %889 = vmatprep.mubr.bf16.mxu1 %v991_v6  ;;  %v992_v11 = vld [vmem:[%s1328_s26 + $0x28] sm:$0xff]   ;;  %v989_v12 = vld [vmem:[%s1328_s26 + $0x10] sm:$0xff]   ;;  %v990_v14 = vld [vmem:[%s1328_s26 + $0x18] sm:$0xff]   ;;  %s1057_s28 = sshll.u32 %s1161_s27, 4  ;;  %s1058_s28 = int_to_ptr.vmem [resolvable:$false] %s1057_s28 }
  0x5c   : > { %v993_v13 = vld [vmem:[%s1328_s26 + $0x30] sm:$0xff]   ;;  %v994_v15 = vld [vmem:[%s1328_s26 + $0x38] sm:$0xff]   ;;  %p1055_p6 = pnand %p1054_p4, %p1271_p12  ;;  %s1059_s23 = scalar_lea.vmem %s1058_s28, 2048 }
  0x5d   : > { %868 = vmatpush3.bf16.msra.mxu0 %v980_v1  ;;  %906 = vmatpush3.bf16.msra.mxu1 %v980_v1  ;;  %p1060_p11 = scmp.lt.s32.totalorder %s1383_s20, %s1058_s28  ;;  %p1061_p13 = scmp.lt.s32.totalorder %s1059_s23, %s1053_s11 }
  0x5e   : > { %869 = vmatprep.subr.bf16.mxu0 %v981_v2  ;;  %899 = vmatprep.subr.bf16.mxu1 %v981_v2  ;;  %p1056_p8 = pneg %p1055_p6 }
  0x5f   : > { %p1062_p3 = por %p1061_p13, %p1060_p11 }
  0x61   : > { %870 = vmatpush3.bf16.msra.mxu0 %v981_v2  ;;  %907 = vmatpush3.bf16.msra.mxu1 %v981_v2  ;;  %p1063_p7 = pnand %p1062_p3, %p1056_p8 }
  0x62   : > { %871 = vmatprep.subr.bf16.mxu0 %v982_v3  ;;  %900 = vmatprep.subr.bf16.mxu1 %v982_v3 }
  0x65   : > { %872 = vmatpush3.bf16.msra.mxu0 %v982_v3  ;;  %908 = vmatpush3.bf16.msra.mxu1 %v982_v3 }
  0x66   : > { %873 = vmatprep.subr.bf16.mxu0 %v983_v5  ;;  %901 = vmatprep.subr.bf16.mxu1 %v983_v5 }
  0x69   : > { %874 = vmatpush3.bf16.msra.mxu0 %v983_v5  ;;  %909 = vmatpush3.bf16.msra.mxu1 %v983_v5 }
  0x6a   : > { %875 = vmatprep.subr.bf16.mxu0 %v984_v7  ;;  %902 = vmatprep.subr.bf16.mxu1 %v984_v7 }
  0x6d   : > { %876 = vmatpush3.bf16.msra.mxu0 %v984_v7  ;;  %910 = vmatpush3.bf16.msra.mxu1 %v984_v7 }
  0x6e   : > { %877 = vmatprep.subr.bf16.mxu0 %v985_v8  ;;  %903 = vmatprep.subr.bf16.mxu1 %v985_v8 }
  0x71   : > { %878 = vmatpush3.bf16.msra.mxu0 %v985_v8  ;;  %911 = vmatpush3.bf16.msra.mxu1 %v985_v8 }
  0x72   : > { %879 = vmatprep.subr.bf16.mxu0 %v986_v9  ;;  %904 = vmatprep.subr.bf16.mxu1 %v986_v9 }
  0x75   : > { %880 = vmatpush3.bf16.msra.mxu0 %v986_v9  ;;  %912 = vmatpush3.bf16.msra.mxu1 %v986_v9 }
  0x78   : > { %882 = vmatmul.mubr.bf16.vlgmr.msra.gmra.mrb[0].mxu0 %v988_v10  ;;  %890 = vmatmul.mubr.bf16.vlgmr.msra.gmra.mrb[0].mxu1 %v992_v11 }
  0x79   : > { %885 = vmatprep.mubr.bf16.mxu0 %v989_v12  ;;  %893 = vmatprep.mubr.bf16.mxu1 %v993_v13 }
  0x80   : > { %886 = vmatmul.mubr.bf16.gmra.mrb[4].mxu0 %v990_v14  ;;  %894 = vmatmul.mubr.bf16.gmra.mrb[4].mxu1 %v994_v15 }
 0x14b   : > { %v883_v16 = vpop.f32.mrb[0].mxu0  ;;  %v1346_v17 = vpop.f32.mrb[0].mxu1 }
 0x14c   : > { %v380_v18 = vpop.f32.mrb[1].mxu0  ;;  %v1348_v19 = vpop.f32.mrb[1].mxu1  ;;  %v546_v31 = vmul.f32 %v883_v16, %v883_v16 }
 0x14d   : > { %v884_v20 = vpop.f32.mrb[2].mxu0  ;;  %v1350_v21 = vpop.f32.mrb[2].mxu1  ;;  %v544_v22 = vmul.f32 %v380_v18, %v380_v18  ;;  %v552_v61 = vmul.f32 %v1348_v19, %v1348_v19 }
 0x14e   : > { %v810_v23 = vpack.c.bf16 %v884_v20, %v883_v16  ;;  %v383_v24 = vpop.f32.mrb[3].mxu0  ;;  %v830_v25 = vpack.c.bf16 %v1350_v21, %v1346_v17  ;;  %v1354_v26 = vpop.f32.mrb[3].mxu1  ;;  %v547_v34 = vmul.f32 %v884_v20, %v884_v20 }
 0x14f   : > { %v805_v27 = vpack.c.bf16 %v383_v24, %v380_v18  ;;  %v523_v28 = vadd.f32 %v383_v24, %v380_v18  ;;  %v545_v29 = vmul.f32 %v383_v24, %v383_v24  ;;  %v825_v30 = vpack.c.bf16 %v1354_v26, %v1348_v19 }
 0x150   : > { %842 = vst [vmem:[%s1360_s18 + $0x8] sm:$0xff] %v810_v23   ;;  %846 = vst [vmem:[%s1360_s18 + $0x28] sm:$0xff] %v830_v25  }
 0x151   : > { %806 = vst [vmem:[%s1360_s18] sm:$0xff] %v805_v27   ;;  %v524_v32 = vadd.f32 %v883_v16, %v523_v28  ;;  %v560_v33 = vadd.f32 %v545_v29, %v544_v22  ;;  %845 = vst [vmem:[%s1360_s18 + $0x20] sm:$0xff] %v825_v30  }
 0x153   : > { %v561_v35 = vadd.f32 %v560_v33, %v546_v31  ;;  %v887_v36 = vpop.f32.mrb[4].mxu0  ;;  %v525_v37 = vadd.f32 %v884_v20, %v524_v32  ;;  %v1366_v38 = vpop.f32.mrb[4].mxu1 }
 0x154   : > { %v396_v39 = vpop.f32.mrb[5].mxu0  ;;  %v1369_v40 = vpop.f32.mrb[5].mxu1  ;;  %v550_v55 = vmul.f32 %v887_v36, %v887_v36 }
 0x155   : > { %v526_v41 = vadd.f32 %v525_v37, %v396_v39  ;;  %v548_v42 = vmul.f32 %v396_v39, %v396_v39  ;;  %v562_v43 = vadd.f32 %v561_v35, %v547_v34  ;;  %v888_v44 = vpop.f32.mrb[6].mxu0  ;;  %v1372_v45 = vpop.f32.mrb[6].mxu1 }
 0x156   : > { %v820_v46 = vpack.c.bf16 %v888_v44, %v887_v36  ;;  %v399_v47 = vpop.f32.mrb[7].mxu0  ;;  %v840_v48 = vpack.c.bf16 %v1372_v45, %v1366_v38  ;;  %v1376_v49 = vpop.f32.mrb[7].mxu1  ;;  %v551_v58 = vmul.f32 %v888_v44, %v888_v44 }
 0x157   : > { %v563_v50 = vadd.f32 %v562_v43, %v548_v42  ;;  %v815_v51 = vpack.c.bf16 %v399_v47, %v396_v39  ;;  %v527_v52 = vadd.f32 %v526_v41, %v399_v47  ;;  %v549_v53 = vmul.f32 %v399_v47, %v399_v47 }
 0x158   : > { %844 = vst [vmem:[%s1360_s18 + $0x18] sm:$0xff] %v820_v46   ;;  %848 = vst [vmem:[%s1360_s18 + $0x38] sm:$0xff] %v840_v48   ;;  %v835_v54 = vpack.c.bf16 %v1376_v49, %v1369_v40 }
 0x159   : > { %843 = vst [vmem:[%s1360_s18 + $0x10] sm:$0xff] %v815_v51   ;;  %v528_v56 = vadd.f32 %v887_v36, %v527_v52  ;;  %v564_v57 = vadd.f32 %v563_v50, %v549_v53 }
 0x15a   : > { %847 = vst [vmem:[%s1360_s18 + $0x30] sm:$0xff] %v835_v54  }
 0x15b   : > { %v565_v59 = vadd.f32 %v564_v57, %v550_v55  ;;  %v529_v60 = vadd.f32 %v888_v44, %v528_v56 }
 0x15c   : > { %1066 = shalt.err (!%p1063_p7)
}
 0x15d   : > { %s1067_s29 = scalar_lea.hbm %s1381_s25, 1024  ;;  %s1071_s7 = scalar_lea.hbm %s1489_s2, 4096 }
 0x15e   : > { %p1068_p9 = scmp.ne.s32.totalorder %s1381_s25, %s1067_s29  ;;  %p1072_p5 = scmp.lt.u32.totalorder %s1381_s25, %s1489_s2 }
 0x15f   : > { %p1073_p10 = scmp.lt.u32.totalorder %s1071_s7, %s1067_s29  ;;  %p1075_p4 = scmp.lt.u32.totalorder %s1067_s29, %s1381_s25 }
 0x160   : > { %p1069_p1 = pnand %p1068_p9, %p1271_p12 }
 0x161   : > { %p1074_p2 = por %p1073_p10, %p1072_p5 }
 0x162   : > { %p1070_p0 = pneg %p1069_p1 }
 0x163   : > { %p1076_p6 = por %p1075_p4, %p1074_p2 }
 0x165   : > { %p1077_p8 = pnand %p1076_p6, %p1070_p0 }
 0x167   : > { %1080 = shalt.err (!%p1077_p8)
}
 0x168   : > { %s1162_s18 = smov 64   ;;  %s1163_s8 = smov 4   ;;  %v530_v62 = vadd.f32 %v529_v60, %v1348_v19  ;;  %v566_v63 = vadd.f32 %v565_v59, %v551_v58  ;;  %v553_v2 = vmul.f32 %v1354_v26, %v1354_v26  ;;  %v554_v3 = vmul.f32 %v1346_v17, %v1346_v17 }
 0x169   : > { %919 = dma.vmem_to_hbm [thread:$0]  (%p1271_p12), %s1383_s20, 1024, %s1381_s25, %s587_s5, %s1162_s18, %s1162_s18, %s1163_s8   ;;  %v555_v6 = vmul.f32 %v1350_v21, %v1350_v21  ;;  %v556_v9 = vmul.f32 %v1369_v40, %v1369_v40  ;;  %v557_v14 = vmul.f32 %v1376_v49, %v1376_v49  ;;  %v558_v15 = vmul.f32 %v1366_v38, %v1366_v38 }
 0x16a   : > { %v567_v0 = vadd.f32 %v566_v63, %v552_v61  ;;  %v531_v1 = vadd.f32 %v530_v62, %v1354_v26  ;;  %v559_v18 = vmul.f32 %v1372_v45, %v1372_v45  ;;  %s744_s20 = sshll.u32 %s1322_s6, 3  ;;  %vm581_vm0 = vcmask 1040384   ;;  %s781_s9 = sshll.u32 %s1206_s16, 7 }
 0x16b   : > { %s214_s4 = scalar_lea.vmem [#allocation8], %s744_s20  ;;  %vm583_vm1 = vcmask 1041408   ;;  %s1444_s27 = scalar_lea.hbm %s1490_s3, %s781_s9 }
 0x16c   : > { %v532_v4 = vadd.f32 %v1346_v17, %v531_v1  ;;  %v568_v5 = vadd.f32 %v567_v0, %v553_v2  ;;  %s621_s25 = sshll.u32 %s214_s4, 4  ;;  %s592_s28 = scalar_lea.sflag [#allocation9], %s1322_s6  ;;  %s1446_s25 = int_to_ptr.vmem [resolvable:$true] %s621_s25 }
 0x16d   : > { %s1081_s16 = scalar_lea.vmem %s1446_s25, 128  ;;  %s1164_s23 = smov [#allocation8]  }
 0x16e   : > { %v569_v7 = vadd.f32 %v568_v5, %v554_v3  ;;  %v533_v8 = vadd.f32 %v1350_v21, %v532_v4  ;;  %p1082_p11 = scmp.ne.s32.totalorder %s1446_s25, %s1081_s16  ;;  %s1085_s29 = sshll.u32 %s1164_s23, 4  ;;  %s1086_s29 = int_to_ptr.vmem [resolvable:$false] %s1085_s29 }
 0x16f   : > { %s1087_s30 = scalar_lea.vmem %s1086_s29, 256  ;;  %p1088_p7 = scmp.lt.s32.totalorder %s1446_s25, %s1086_s29 }
 0x170   : > { %v534_v10 = vadd.f32 %v533_v8, %v1369_v40  ;;  %v570_v11 = vadd.f32 %v569_v7, %v555_v6  ;;  %p1083_p13 = pnand %p1082_p11, %p1271_p12  ;;  %p1089_p9 = scmp.lt.s32.totalorder %s1087_s30, %s1081_s16 }
 0x172   : > { %v571_v12 = vadd.f32 %v570_v11, %v556_v9  ;;  %v535_v13 = vadd.f32 %v534_v10, %v1376_v49  ;;  %p1084_p3 = pneg %p1083_p13  ;;  %p1090_p1 = por %p1089_p9, %p1088_p7 }
 0x174   : > { %v536_v16 = vadd.f32 %v1366_v38, %v535_v13  ;;  %v572_v17 = vadd.f32 %v571_v12, %v557_v14  ;;  %p1091_p0 = pnand %p1090_p1, %p1084_p3 }
 0x176   : > { %v537_v19 = vadd.f32 %v1372_v45, %v536_v16  ;;  %v573_v20 = vadd.f32 %v572_v17, %v558_v15 }
 0x178   : > { %v538_v21 = vrot.slane %v537_v19, 4  ;;  %v574_v22 = vadd.f32 %v573_v20, %v559_v18 }
 0x17a   : > { %v539_v23 = vadd.f32 %v538_v21, %v537_v19  ;;  %v575_v24 = vrot.slane %v574_v22, 4 }
 0x17c   : > { %v540_v25 = vrot.slane %v539_v23, 2  ;;  %v576_v26 = vadd.f32 %v575_v24, %v574_v22 }
 0x17e   : > { %v541_v27 = vadd.f32 %v540_v25, %v539_v23  ;;  %v577_v28 = vrot.slane %v576_v26, 2 }
 0x180   : > { %v542_v29 = vrot.slane %v541_v27, 1  ;;  %v578_v30 = vadd.f32 %v577_v28, %v576_v26 }
 0x182   : > { %v579_v31 = vrot.slane %v578_v30, 1  ;;  %v543_v32 = vadd.f32 %v542_v29, %v541_v27 }
 0x184   : > { %v580_v33 = vadd.f32 %v579_v31, %v578_v30 }
 0x186   : > { %v582_v34 = vsel %vm581_vm0, %v543_v32, %v580_v33 }
 0x187   : > { %v584_v35 = vsel %vm583_vm1, %v582_v34, 0.0 }
 0x188   : > { %585 = vst [vmem:[%s214_s4] sm:$0xff] %v584_v35 }
 0x189   : > { %1094 = shalt.err (!%p1091_p0)
}
 0x18a   : > { %s1095_s6 = scalar_lea.hbm %s1444_s27, 128  ;;  %s1099_s10 = scalar_lea.hbm %s1490_s3, 512 }
 0x18b   : > { %p1096_p5 = scmp.ne.s32.totalorder %s1444_s27, %s1095_s6  ;;  %p1100_p4 = scmp.lt.u32.totalorder %s1444_s27, %s1490_s3 }
 0x18c   : > { %p1101_p6 = scmp.lt.u32.totalorder %s1099_s10, %s1095_s6  ;;  %p1103_p11 = scmp.lt.u32.totalorder %s1095_s6, %s1444_s27 }
 0x18d   : > { %p1097_p10 = pnand %p1096_p5, %p1271_p12 }
 0x18e   : > { %p1102_p8 = por %p1101_p6, %p1100_p4 }
 0x18f   : > { %p1098_p2 = pneg %p1097_p10 }
 0x190   : > { %p1104_p13 = por %p1103_p11, %p1102_p8 }
 0x192   : > { %p1105_p3 = pnand %p1104_p13, %p1098_p2 }
 0x194   : > { %1108 = shalt.err (!%p1105_p3)
}
 0x195   : > { %920 = dma.vmem_to_hbm [thread:$0]  (%p1271_p12), %s1446_s25, 128, %s1444_s27, %s592_s28  }
 0x196 PF: > { %p941_p7 = scmp.ge.s32.totalorder %s1155_s15, 2  ;;  %s633_s8 = sand.u32 1, %s1143_s12  }
 0x197   : > { %p1505_p9 = scmp.ne.s32.totalorder %s1495_s19, 0  ;;  %s634_s20 = scalar_lea.sflag [#allocation4], %s633_s8 }
 0x199   : > { %p932_p1 = pnand %p941_p7, %p1505_p9 }
 0x19b   : > { %1134 = dma.done.wait (!%p932_p1), %s634_s20, 1024  }
 0x19c   : > { %1136 = vsyncadd (!%p932_p1), %s634_s20, 4294966272  ;;  %s643_s9 = scalar_lea.sflag [#allocation9], %s633_s8 }
 0x19d   : > { %1138 = dma.done.wait (!%p932_p1), %s643_s9, 128  }
 0x19e   : > { %1140 = vsyncadd (!%p932_p1), %s643_s9, 4294967168  ;;  %p21_p12 = scmp.ge.s32.totalorder %s1238_s24, 6   ;;  %s1506_s12 = smov %s1147_s13 }
 0x19f   : > { %s1507_s13 = smov %s1151_s14  ;;  %s1508_s14 = smov %s1267_s17 }
 0x1a0   : > { %s1509_s15 = smov %s1238_s24  ;;  %23 = sbr.rel (!%p21_p12) target bundleno = 8 (0x8), region = 94 }
 0x1a7   :  { %648 = vsyncpa [#allocation3], 1 }
 0x1a8   :  { %650 = vsyncpa [#allocation3 + $0x1], 1 }
 0x1a9   :  { %651 = vsyncpa [#allocation6], 1 }
 0x1aa   :  { %652 = vsyncpa [#allocation4], 1 }
 0x1ab   :  { %654 = vsyncpa [#allocation4 + $0x1], 1 }
 0x1ac   :  { %655 = vsyncpa [#allocation9], 1 }
 0x1ad   :  { %657 = vsyncpa [#allocation9 + $0x1], 1 }

</bundles_post_ra>
